<compile_context>
chip_gen: v7x
topology: tpu7x:2x2x1
jax: 0.10.0
libtpu: 0.0.40
codegen_flags: <defaults>
</compile_context>

<pallas_src>
import jax
import jax.numpy as jnp
import numpy as np
from jax.experimental import pallas as pl
from jax.experimental.pallas import tpu as pltpu


def _round_up(x, m):
    return ((x + m - 1) // m) * m


# Kernel-side layout (lane-dense: N on the last/lane axis):
#   loc_ref    (1, 2,   TN)  -- [center_offset; log_width_offset] rows
#   cls_ref    (1, C,   TN)  -- class logits rows
#   def_ref    (2, TN)       -- [default_center; default_width] rows
#   scores_ref (1, C-1, TN)  -- softmax probs for classes 1..C-1 (background dropped), f32
#   dec_ref    (1, 2,   TN)  -- [start; end] rows, f32
def _detection_kernel(loc_ref, cls_ref, def_ref, scores_ref, dec_ref):
    C = cls_ref.shape[1]

    # ---- softmax over the class axis (matches nn.Softmax(dim=2)) ----
    # Row-wise over the C class rows: pure VPU max/add on (1, TN) lane-dense
    # rows (no cross-sublane XLU reduction), all math in f32.
    rows = [cls_ref[0, k:k + 1, :] for k in range(C)]   # C x (1, TN)
    m = rows[0]
    for k in range(1, C):
        m = jnp.maximum(m, rows[k])
    e = [jnp.exp(r - m) for r in rows]
    s = e[0]
    for k in range(1, C):
        s = s + e[k]
    inv = pl.reciprocal(s, approx=True)                 # EUP slot, ~free
    # Drop background class 0; store f32 probabilities.
    for k in range(1, C):
        scores_ref[0, k - 1:k, :] = e[k] * inv

    # ---- decode(localizations, localizations_default) ----
    # center = d_center + l_center * d_width ; width = d_width * exp(l_width)
    # output rows: start = center - width/2 ; end = center + width/2
    d_center = def_ref[0:1, :]                          # (1, TN)
    d_width = def_ref[1:2, :]
    l_center = loc_ref[0, 0:1, :]
    l_width = loc_ref[0, 1:2, :]
    center = d_center + l_center * d_width
    half_w = 0.5 * d_width * jnp.exp(l_width)
    dec_ref[0, 0:1, :] = center - half_w                # unmasked lane-dense row store
    dec_ref[0, 1:2, :] = center + half_w


def detection_scores_and_decode(localizations, classifications, localizations_default):
    """Returns (scores[B, C-1, Np] f32, decoded[B, 2, Np] f32, N)."""
    B, N, _ = localizations.shape
    C = classifications.shape[-1]

    # Lane-dense layout: put the big axis N last (layout plumbing in the wrapper).
    loc_t = jnp.transpose(localizations.astype(jnp.float32), (0, 2, 1))        # (B, 2, N)
    cls_t = jnp.transpose(classifications.astype(jnp.float32), (0, 2, 1))      # (B, C, N)
    def_t = jnp.transpose(localizations_default.astype(jnp.float32), (1, 0))   # (2, N)

    # Pad N to a multiple of 128; pick the largest lane tile (128..2048) that
    # divides the padded extent so there is no wasted compute and few steps.
    Np = _round_up(N, 128)
    tile_n = 128
    for cand in (2048, 1024, 512, 256):
        if Np % cand == 0:
            tile_n = cand
            break
    pad = Np - N
    if pad:
        loc_t = jnp.pad(loc_t, ((0, 0), (0, 0), (0, pad)))
        cls_t = jnp.pad(cls_t, ((0, 0), (0, 0), (0, pad)))
        def_t = jnp.pad(def_t, ((0, 0), (0, pad)))

    grid = (B, Np // tile_n)

    scores_t, dec_t = pl.pallas_call(
        _detection_kernel,
        out_shape=(
            jax.ShapeDtypeStruct((B, C - 1, Np), jnp.float32),  # background class dropped
            jax.ShapeDtypeStruct((B, 2, Np), jnp.float32),
        ),
        grid_spec=pltpu.PrefetchScalarGridSpec(
            num_scalar_prefetch=0,
            grid=grid,
            in_specs=[
                pl.BlockSpec((1, 2, tile_n), lambda b, n: (b, 0, n)),
                pl.BlockSpec((1, C, tile_n), lambda b, n: (b, 0, n)),
                pl.BlockSpec((2, tile_n), lambda b, n: (0, n)),
            ],
            out_specs=(
                pl.BlockSpec((1, C - 1, tile_n), lambda b, n: (b, 0, n)),
                pl.BlockSpec((1, 2, tile_n), lambda b, n: (b, 0, n)),
            ),
        ),
        compiler_params=pltpu.CompilerParams(
            dimension_semantics=("parallel", "parallel"),
        ),
    )(loc_t, cls_t, def_t)
    return scores_t, dec_t, N


def _non_maximum_suppression(intervals, scores, overlap):
    """Greedy 1-D NMS; returns kept intervals sorted by descending score."""
    order = np.argsort(-scores)
    kept = []
    while order.size > 0:
        i = order[0]
        kept.append(intervals[i])
        if order.size == 1:
            break
        rest = order[1:]
        inter_start = np.maximum(intervals[i, 0], intervals[rest, 0])
        inter_end = np.minimum(intervals[i, 1], intervals[rest, 1])
        inter = np.clip(inter_end - inter_start, 0.0, None)
        len_i = intervals[i, 1] - intervals[i, 0]
        len_r = intervals[rest, 1] - intervals[rest, 0]
        union = len_i + len_r - inter
        iou = inter / np.maximum(union, 1e-12)
        order = rest[iou <= overlap]
    return kept


def detection_forward(localizations, classifications, localizations_default,
                      number_of_classes, overlap_non_maximum_suppression,
                      classification_threshold):
    scores_t, dec_t, N = detection_scores_and_decode(
        jnp.asarray(localizations, jnp.float32),
        jnp.asarray(classifications, jnp.float32),
        jnp.asarray(localizations_default, jnp.float32),
    )
    scores_np = np.asarray(jax.block_until_ready(scores_t))[:, :, :N]   # (B, C-1, N) f32
    decoded_np = np.asarray(jax.block_until_ready(dec_t))[:, :, :N]     # (B, 2, N) f32

    # TODO(synk): thresholding + greedy NMS produce ragged, data-dependent
    # Python lists (no clean Pallas equivalent); kept host-side like PyTorch.
    batch = localizations.shape[0]
    results = []
    for i in range(batch):
        result = []
        localization_decoded = decoded_np[i].T                       # (N, 2) = (start, end)
        for class_index in range(1, number_of_classes):
            scores_batch_class = scores_np[i, class_index - 1]       # (N,)
            mask = scores_batch_class > classification_threshold
            if not mask.any():
                continue
            selected_loc = localization_decoded[mask]
            selected_scores = scores_batch_class[mask]
            events = _non_maximum_suppression(
                selected_loc, selected_scores,
                overlap=overlap_non_maximum_suppression)
            result.extend([(float(ev[0]), float(ev[1]), class_index - 1)
                           for ev in events])
        result = [ev for ev in result if ev[0] > -10 and ev[1] < 10]
        results.append(result)
    return results


if __name__ == "__main__":
    key = jax.random.PRNGKey(0)
    B, N, C = 2, 16, 3  # batch, num default events, num classes (class 0 = background)

    k_loc, k_cls = jax.random.split(key)
    localizations = 0.1 * jax.random.normal(k_loc, (B, N, 2), dtype=jnp.float32)
    classifications = jax.random.normal(k_cls, (B, N, C), dtype=jnp.float32)

    # Deterministic default events: evenly spaced centers, constant width.
    centers = jnp.linspace(0.1, 0.9, N, dtype=jnp.float32)
    widths = jnp.full((N,), 0.15, dtype=jnp.float32)
    localizations_default = jnp.stack([centers, widths], axis=-1)  # (N, 2)

    results = detection_forward(
        localizations, classifications, localizations_default,
        number_of_classes=C,
        overlap_non_maximum_suppression=0.5,
        classification_threshold=0.3,
    )
    assert len(results) == B
    print("KERNEL_OK")
</pallas_src>

<mosaic_0001>
module attributes {stable_mosaic.version = 11 : i64} {
  func.func @_detection_kernel(%arg0: i32, %arg1: i32, %arg2: memref<1x2x128xf32, #tpu.memory_space<vmem>>, %arg3: memref<1x3x128xf32, #tpu.memory_space<vmem>>, %arg4: memref<2x128xf32, #tpu.memory_space<vmem>>, %arg5: memref<1x2x128xf32, #tpu.memory_space<vmem>>, %arg6: memref<1x2x128xf32, #tpu.memory_space<vmem>>) attributes {dimension_semantics = [#tpu.dimension_semantics<parallel>, #tpu.dimension_semantics<parallel>], iteration_bounds = array<i64: 2, 1>, scalar_prefetch = 0 : i64, scratch_operands = 0 : i64, tpu.core_type = #tpu.core_type<tc>, window_params = [{transform_indices = @transform_0, window_bounds = array<i64: 1, 2, 128>}, {transform_indices = @transform_1, window_bounds = array<i64: 1, 3, 128>}, {transform_indices = @transform_2, window_bounds = array<i64: 2, 128>}, {transform_indices = @transform_3, window_bounds = array<i64: 1, 2, 128>}, {transform_indices = @transform_4, window_bounds = array<i64: 1, 2, 128>}]} {
    %c0 = arith.constant 0 : index
    %c0_0 = arith.constant 0 : index
    %c0_1 = arith.constant 0 : index
    %0 = vector.load %arg3[%c0, %c0_0, %c0_1] : memref<1x3x128xf32, #tpu.memory_space<vmem>>, vector<1x1x128xf32>
    %1 = vector.shape_cast %0 : vector<1x1x128xf32> to vector<1x128xf32>
    %c0_2 = arith.constant 0 : index
    %c1 = arith.constant 1 : index
    %c0_3 = arith.constant 0 : index
    %2 = vector.load %arg3[%c0_2, %c1, %c0_3] : memref<1x3x128xf32, #tpu.memory_space<vmem>>, vector<1x1x128xf32>
    %3 = vector.shape_cast %2 : vector<1x1x128xf32> to vector<1x128xf32>
    %c0_4 = arith.constant 0 : index
    %c2 = arith.constant 2 : index
    %c0_5 = arith.constant 0 : index
    %4 = vector.load %arg3[%c0_4, %c2, %c0_5] : memref<1x3x128xf32, #tpu.memory_space<vmem>>, vector<1x1x128xf32>
    %5 = vector.shape_cast %4 : vector<1x1x128xf32> to vector<1x128xf32>
    %6 = arith.maximumf %1, %3 : vector<1x128xf32>
    %7 = arith.maximumf %6, %5 : vector<1x128xf32>
    %8 = arith.subf %1, %7 : vector<1x128xf32>
    %9 = math.exp %8 : vector<1x128xf32>
    %10 = arith.subf %3, %7 : vector<1x128xf32>
    %11 = math.exp %10 : vector<1x128xf32>
    %12 = arith.subf %5, %7 : vector<1x128xf32>
    %13 = math.exp %12 : vector<1x128xf32>
    %14 = arith.addf %9, %11 : vector<1x128xf32>
    %15 = arith.addf %14, %13 : vector<1x128xf32>
    %16 = tpu.reciprocal %15 {approx = true} : vector<1x128xf32> -> vector<1x128xf32>
    %17 = arith.mulf %11, %16 : vector<1x128xf32>
    %c0_6 = arith.constant 0 : index
    %c0_7 = arith.constant 0 : index
    %c0_8 = arith.constant 0 : index
    %18 = vector.load %arg5[%c0_6, %c0_7, %c0_8] : memref<1x2x128xf32, #tpu.memory_space<vmem>>, vector<1x1x128xf32>
    %19 = vector.shape_cast %18 : vector<1x1x128xf32> to vector<1x128xf32>
    %20 = vector.shape_cast %17 : vector<1x128xf32> to vector<1x1x128xf32>
    tpu.vector_store %arg5[%c0_6, %c0_7, %c0_8], %20 {strides = array<i32>} : memref<1x2x128xf32, #tpu.memory_space<vmem>>, vector<1x1x128xf32>,
    %21 = arith.mulf %13, %16 : vector<1x128xf32>
    %c0_9 = arith.constant 0 : index
    %c1_10 = arith.constant 1 : index
    %c0_11 = arith.constant 0 : index
    %22 = vector.load %arg5[%c0_9, %c1_10, %c0_11] : memref<1x2x128xf32, #tpu.memory_space<vmem>>, vector<1x1x128xf32>
    %23 = vector.shape_cast %22 : vector<1x1x128xf32> to vector<1x128xf32>
    %24 = vector.shape_cast %21 : vector<1x128xf32> to vector<1x1x128xf32>
    tpu.vector_store %arg5[%c0_9, %c1_10, %c0_11], %24 {strides = array<i32>} : memref<1x2x128xf32, #tpu.memory_space<vmem>>, vector<1x1x128xf32>,
    %c0_12 = arith.constant 0 : index
    %c0_13 = arith.constant 0 : index
    %25 = vector.load %arg4[%c0_12, %c0_13] : memref<2x128xf32, #tpu.memory_space<vmem>>, vector<1x128xf32>
    %c1_14 = arith.constant 1 : index
    %c0_15 = arith.constant 0 : index
    %26 = vector.load %arg4[%c1_14, %c0_15] : memref<2x128xf32, #tpu.memory_space<vmem>>, vector<1x128xf32>
    %c0_16 = arith.constant 0 : index
    %c0_17 = arith.constant 0 : index
    %c0_18 = arith.constant 0 : index
    %27 = vector.load %arg2[%c0_16, %c0_17, %c0_18] : memref<1x2x128xf32, #tpu.memory_space<vmem>>, vector<1x1x128xf32>
    %28 = vector.shape_cast %27 : vector<1x1x128xf32> to vector<1x128xf32>
    %c0_19 = arith.constant 0 : index
    %c1_20 = arith.constant 1 : index
    %c0_21 = arith.constant 0 : index
    %29 = vector.load %arg2[%c0_19, %c1_20, %c0_21] : memref<1x2x128xf32, #tpu.memory_space<vmem>>, vector<1x1x128xf32>
    %30 = vector.shape_cast %29 : vector<1x1x128xf32> to vector<1x128xf32>
    %31 = arith.mulf %28, %26 : vector<1x128xf32>
    %32 = arith.addf %25, %31 : vector<1x128xf32>
    %cst = arith.constant 5.000000e-01 : f32
    %33 = vector.broadcast %cst : f32 to vector<1x128xf32>
    %34 = arith.mulf %33, %26 : vector<1x128xf32>
    %35 = math.exp %30 : vector<1x128xf32>
    %36 = arith.mulf %34, %35 : vector<1x128xf32>
    %37 = arith.subf %32, %36 : vector<1x128xf32>
    %c0_22 = arith.constant 0 : index
    %c0_23 = arith.constant 0 : index
    %c0_24 = arith.constant 0 : index
    %38 = vector.load %arg6[%c0_22, %c0_23, %c0_24] : memref<1x2x128xf32, #tpu.memory_space<vmem>>, vector<1x1x128xf32>
    %39 = vector.shape_cast %38 : vector<1x1x128xf32> to vector<1x128xf32>
    %40 = vector.shape_cast %37 : vector<1x128xf32> to vector<1x1x128xf32>
    tpu.vector_store %arg6[%c0_22, %c0_23, %c0_24], %40 {strides = array<i32>} : memref<1x2x128xf32, #tpu.memory_space<vmem>>, vector<1x1x128xf32>,
    %41 = arith.addf %32, %36 : vector<1x128xf32>
    %c0_25 = arith.constant 0 : index
    %c1_26 = arith.constant 1 : index
    %c0_27 = arith.constant 0 : index
    %42 = vector.load %arg6[%c0_25, %c1_26, %c0_27] : memref<1x2x128xf32, #tpu.memory_space<vmem>>, vector<1x1x128xf32>
    %43 = vector.shape_cast %42 : vector<1x1x128xf32> to vector<1x128xf32>
    %44 = vector.shape_cast %41 : vector<1x128xf32> to vector<1x1x128xf32>
    tpu.vector_store %arg6[%c0_25, %c1_26, %c0_27], %44 {strides = array<i32>} : memref<1x2x128xf32, #tpu.memory_space<vmem>>, vector<1x1x128xf32>,
    return
  }
  func.func @transform_0(%arg0: i32, %arg1: i32) -> (i32, i32, i32) {
    %c0_i32 = arith.constant 0 : i32
    %c0_i32_0 = arith.constant 0 : i32
    return %arg0, %c0_i32, %arg1 : i32, i32, i32
  }
  func.func @transform_1(%arg0: i32, %arg1: i32) -> (i32, i32, i32) {
    %c0_i32 = arith.constant 0 : i32
    %c0_i32_0 = arith.constant 0 : i32
    return %arg0, %c0_i32, %arg1 : i32, i32, i32
  }
  func.func @transform_2(%arg0: i32, %arg1: i32) -> (i32, i32) {
    %c0_i32 = arith.constant 0 : i32
    %c0_i32_0 = arith.constant 0 : i32
    return %c0_i32, %arg1 : i32, i32
  }
  func.func @transform_3(%arg0: i32, %arg1: i32) -> (i32, i32, i32) {
    %c0_i32 = arith.constant 0 : i32
    %c0_i32_0 = arith.constant 0 : i32
    return %arg0, %c0_i32, %arg1 : i32, i32, i32
  }
  func.func @transform_4(%arg0: i32, %arg1: i32) -> (i32, i32, i32) {
    %c0_i32 = arith.constant 0 : i32
    %c0_i32_0 = arith.constant 0 : i32
    return %arg0, %c0_i32, %arg1 : i32, i32, i32
  }
}

</mosaic_0001>

<bundles_post_ra>
// kernel: tpu_custom_call.1
= control target key start
LH: loop header
LB: loop body
LE: loop exit
PB: predicated region body
PF: predicated region fallthrough
CT: control target
= control target key end

     0   :  { %10 = vsyncpa [#allocation3], 0  ;;  %s866_s0 = inlined_call_operand.vmem [shape: f32[2,2,128], index: 0, kind: input, shape index: {}]   ;;  %s867_s1 = inlined_call_operand.vmem [shape: f32[2,3,128], index: 1, kind: input, shape index: {}]   ;;  %s868_s2 = inlined_call_operand.vmem [shape: f32[2,128], index: 2, kind: input, shape index: {}]   ;;  %s869_s3 = inlined_call_operand.hbm [shape: f32[2,2,128], index: 3, kind: output, shape index: {0}]   ;;  %s870_s4 = inlined_call_operand.hbm [shape: f32[2,2,128], index: 4, kind: output, shape index: {1}]  }
   0x1   :  { %12 = vsyncpa [#allocation3 + $0x1], 0 }
   0x2   :  { %13 = vsyncpa [#allocation5], 0 }
   0x3   :  { %15 = vsyncpa [#allocation5 + $0x1], 0  ;;  %s704_s15 = smov 0   ;;  %s706_s16 = smov 0  }
   0x4   :  { %s708_s17 = smov 0   ;;  %s710_s18 = smov 0  }
   0x5   :  { %s712_s19 = smov 0   ;;  %s714_s20 = smov 0  }
   0x6 LB: > { %s479_s21 = sadd.s32 4294967295, %s675_s20   ;;  %s480_s22 = sadd.s32 4294967294, %s675_s20   ;;  %s675_s20 = sphi %s714_s20, %s21_s20   ;;  %s671_s19 = sphi %s712_s19, %s877_s19   ;;  %s667_s18 = sphi %s710_s18, %s876_s18   ;;  %s663_s17 = sphi %s708_s17, %s875_s17   ;;  %s659_s16 = sphi %s706_s16, %s874_s16   ;;  %s655_s15 = sphi %s704_s15, %s873_s15  }
   0x7   : > { %s33_s23 = sadd.s32 1, %s671_s19  ;;  %s124_s24 = sadd.s32 1, %s663_s17 }
   0x8   : > { %p35_p0 = scmp.ge.s32.totalorder %s33_s23, 2  ;;  %p134_p1 = scmp.ne.s32.totalorder %s663_s17, %s659_s16 }
   0x9   : > { %p135_p2 = scmp.eq.s32.totalorder %s479_s21, 1  ;;  %p140_p3 = scmp.ne.s32.totalorder %s659_s16, %s655_s15 }
   0xa   : > { %s879_s23 = smov (%p35_p0, %s33_s23), 0  ;;  %p141_p5 = scmp.eq.s32.totalorder %s480_s22, 1 }
   0xb   : > { %p744_p4 = por %p135_p2, %p134_p1  ;;  %s119_s26 = ssub.s32 %s671_s19, %s879_s23 }
   0xc   : > { %p484_p6 = scmp.ge.s32.totalorder %s675_s20, 1  ;;  %p122_p7 = scmp.eq.s32.totalorder %s119_s26, 0 }
   0xd   : > { %p751_p8 = por %p141_p5, %p140_p3  ;;  %p214_p9 = scmp.lt.s32.totalorder %s675_s20, 3 }
   0xe   : > { %s757_s28 = scalar_select %p122_p7, %s663_s17, %s124_s24  }
   0xf   : > { %p215_p10 = pnand %p484_p6, %p214_p9 }
  0x10   : > { %p258_p11 = scmp.lt.s32.totalorder (!%p215_p10), %s667_s18, 1  ;;  %s768_s12 = sand.u32 (!%p215_p10), 1, %s659_s16   ;;  %v298_v10 = vld [vmem:[%s868_s2 + $0x1] sm:$0x1] (!%p215_p10)  ;;  %v297_v16 = vld [vmem:[%s868_s2] sm:$0x1] (!%p215_p10) }
  0x11   : > { %218 = sbr.rel (%p215_p10) target bundleno = 92 (0x5c), region = 32  ;;  %s485_s13 = sshll.u32 (!%p215_p10), %s768_s12, 1  ;;  %v303_v17 = vmul.f32 (!%p215_p10), 0.5, %v298_v10 }
  0x12   : > { %s257_s26 = scalar_lea.vmem (!%p215_p10), [#allocation4], %s485_s13  ;;  %s677_s10 = smov (!%p215_p10), [#allocation4]  }
  0x18   : > { %s259_s29 = scalar_select %p258_p11, %s667_s18, 1 }
  0x1a   : > { %s488_s30 = sshll.u32 %s259_s29, 2  ;;  %s487_s8 = sshll.u32 %s259_s29, 1 }
  0x1b   : > { %s271_s7 = scalar_lea.vmem %s867_s1, %s488_s30  ;;  %s264_s11 = scalar_lea.vmem %s866_s0, %s487_s8 }
  0x1c   : > { %v276_v0 = vld [vmem:[%s271_s7] sm:$0x1]  ;;  %v277_v1 = vld [vmem:[%s271_s7 + $0x1] sm:$0x1]  ;;  %v278_v2 = vld [vmem:[%s271_s7 + $0x2] sm:$0x1] }
  0x1d   : > { %v279_v3 = vmax.f32 %v276_v0, %v277_v1  ;;  %v300_v4 = vld [vmem:[%s264_s11 + $0x1] sm:$0x1]  ;;  %v299_v11 = vld [vmem:[%s264_s11] sm:$0x1]  ;;  %s345_s29 = sshll.u32 %s257_s26, 4  ;;  %s491_s30 = sshll.u32 %s667_s18, 5  ;;  %s780_s29 = int_to_ptr.vmem [resolvable:$true] %s345_s29 }
  0x1e   : > { %v304_v5 = vmul.f32 1.442695, %v300_v4  ;;  %v301_v15 = vmul.f32 %v299_v11, %v298_v10  ;;  %s787_s7 = scalar_lea.hbm %s870_s4, %s491_s30  ;;  %s317_s8 = scalar_lea.sflag [#allocation5], %s768_s12 }
  0x1f   : > { %v280_v6 = vmax.f32 %v279_v3, %v278_v2  ;;  %s565_s9 = scalar_lea.vmem %s780_s29, 32  ;;  %s569_s11 = sshll.u32 %s677_s10, 4  ;;  %s570_s11 = int_to_ptr.vmem [resolvable:$false] %s569_s11 }
  0x20   : > { %555 = vpow2.f32 %v304_v5  ;;  %v302_v18 = vadd.f32 %v301_v15, %v297_v16  ;;  %p566_p12 = scmp.ne.s32.totalorder %s780_s29, %s565_s9  ;;  %s571_s14 = scalar_lea.vmem %s570_s11, 64 }
  0x21   : > { %v281_v7 = vsub.f32 %v276_v0, %v280_v6  ;;  %v284_v8 = vsub.f32 %v277_v1, %v280_v6  ;;  %v287_v9 = vsub.f32 %v278_v2, %v280_v6  ;;  %p572_p1 = scmp.lt.s32.totalorder %s780_s29, %s570_s11  ;;  %p573_p2 = scmp.lt.s32.totalorder %s571_s14, %s565_s9 }
  0x22   : > { %p567_p13 = pnand %p566_p12, %p744_p4 }
  0x23   : > { %v282_v12 = vmul.f32 1.442695, %v281_v7  ;;  %v285_v13 = vmul.f32 1.442695, %v284_v8  ;;  %v288_v14 = vmul.f32 1.442695, %v287_v9  ;;  %p574_p3 = por %p573_p2, %p572_p1 }
  0x24   : > { %p568_p0 = pneg %p567_p13 }
  0x25   : > { %557 = vpow2.f32 %v282_v12 }
  0x26   : > { %559 = vpow2.f32 %v285_v13  ;;  %p575_p5 = pnand %p574_p3, %p568_p0 }
  0x27   : > { %561 = vpow2.f32 %v288_v14 }
  0x2a   : > { %v556_v19 = vpop.eup %555 }
  0x2b   : > { %v306_v20 = vmul.f32 %v556_v19, %v303_v17 }
  0x2d   : > { %v307_v21 = vsub.f32 %v302_v18, %v306_v20  ;;  %v309_v22 = vadd.f32 %v306_v20, %v302_v18 }
  0x2f   : > { %v558_v23 = vpop.eup %557  ;;  %308 = vst [vmem:[%s257_s26] sm:$0x1] %v307_v21  ;;  %310 = vst [vmem:[%s257_s26 + $0x1] sm:$0x1] %v309_v22 }
  0x30   : > { %v560_v24 = vpop.eup %559 }
  0x31   : > { %578 = shalt.err (!%p575_p5)
}
  0x32   : > { %s579_s21 = scalar_lea.hbm %s787_s7, 32  ;;  %s583_s26 = scalar_lea.hbm %s870_s4, 64 }
  0x33   : > { %p580_p6 = scmp.ne.s32.totalorder %s787_s7, %s579_s21  ;;  %p584_p10 = scmp.lt.u32.totalorder %s787_s7, %s870_s4 }
  0x34   : > { %p585_p11 = scmp.lt.u32.totalorder %s583_s26, %s579_s21  ;;  %p587_p13 = scmp.lt.u32.totalorder %s579_s21, %s787_s7 }
  0x35   : > { %p581_p7 = pnand %p580_p6, %p744_p4 }
  0x36   : > { %p586_p12 = por %p585_p11, %p584_p10 }
  0x37   : > { %p582_p9 = pneg %p581_p7 }
  0x38   : > { %p588_p0 = por %p587_p13, %p586_p12 }
  0x3a   : > { %p589_p1 = pnand %p588_p0, %p582_p9 }
  0x3c   : > { %592 = shalt.err (!%p589_p1)
}
  0x3d   : > { %496 = dma.vmem_to_hbm [thread:$0]  (%p744_p4), %s780_s29, 32, %s787_s7, %s317_s8   ;;  %v562_v25 = vpop.eup %561  ;;  %v290_v26 = vadd.f32 %v560_v24, %v558_v23 }
  0x3e   : > { %s250_s9 = scalar_lea.vmem [#allocation2], %s485_s13  ;;  %s820_s29 = scalar_lea.hbm %s869_s3, %s491_s30 }
  0x3f   : > { %v291_v27 = vadd.f32 %v562_v25, %v290_v26  ;;  %s331_s10 = sshll.u32 %s250_s9, 4  ;;  %s312_s7 = scalar_lea.sflag [#allocation3], %s768_s12  ;;  %s813_s10 = int_to_ptr.vmem [resolvable:$true] %s331_s10 }
  0x40   : > { %s593_s8 = scalar_lea.vmem %s813_s10, 32  ;;  %s678_s13 = smov [#allocation2]  }
  0x41   : > { %563 = vrcp.f32 %v291_v27  ;;  %p594_p2 = scmp.ne.s32.totalorder %s813_s10, %s593_s8  ;;  %s597_s21 = sshll.u32 %s678_s13, 4  ;;  %s598_s21 = int_to_ptr.vmem [resolvable:$false] %s597_s21 }
  0x42   : > { %s599_s22 = scalar_lea.vmem %s598_s21, 64  ;;  %p600_p6 = scmp.lt.s32.totalorder %s813_s10, %s598_s21 }
  0x43   : > { %p595_p3 = pnand %p594_p2, %p744_p4  ;;  %p601_p7 = scmp.lt.s32.totalorder %s599_s22, %s593_s8 }
  0x45   : > { %p596_p5 = pneg %p595_p3  ;;  %p602_p9 = por %p601_p7, %p600_p6 }
  0x47   : > { %p603_p10 = pnand %p602_p9, %p596_p5 }
  0x4b   : > { %v564_v28 = vpop.eup %563 }
  0x4c   : > { %v293_v29 = vmul.f32 %v564_v28, %v560_v24  ;;  %v295_v30 = vmul.f32 %v564_v28, %v562_v25 }
  0x4e   : > { %294 = vst [vmem:[%s250_s9] sm:$0x1] %v293_v29  ;;  %296 = vst [vmem:[%s250_s9 + $0x1] sm:$0x1] %v295_v30 }
  0x4f   : > { %606 = shalt.err (!%p603_p10)
}
  0x50   : > { %s607_s18 = scalar_lea.hbm %s820_s29, 32  ;;  %s611_s24 = scalar_lea.hbm %s869_s3, 64 }
  0x51   : > { %p608_p11 = scmp.ne.s32.totalorder %s820_s29, %s607_s18  ;;  %p612_p0 = scmp.lt.u32.totalorder %s820_s29, %s869_s3 }
  0x52   : > { %p613_p1 = scmp.lt.u32.totalorder %s611_s24, %s607_s18  ;;  %p615_p3 = scmp.lt.u32.totalorder %s607_s18, %s820_s29 }
  0x53   : > { %p609_p12 = pnand %p608_p11, %p744_p4 }
  0x54   : > { %p614_p2 = por %p613_p1, %p612_p0 }
  0x55   : > { %p610_p13 = pneg %p609_p12 }
  0x56   : > { %p616_p5 = por %p615_p3, %p614_p2 }
  0x58   : > { %p617_p6 = pnand %p616_p5, %p610_p13 }
  0x5a   : > { %620 = shalt.err (!%p617_p6)
}
  0x5b   : > { %495 = dma.vmem_to_hbm [thread:$0]  (%p744_p4), %s813_s10, 32, %s820_s29, %s312_s7  }
  0x5c PF: > { %p506_p7 = scmp.ge.s32.totalorder %s675_s20, 2  ;;  %s357_s6 = sand.u32 1, %s655_s15  }
  0x5d   : > { %s358_s9 = scalar_lea.sflag [#allocation3], %s357_s6 }
  0x5e   : > { %p500_p9 = pnand %p506_p7, %p751_p8 }
  0x60   : > { %646 = dma.done.wait (!%p500_p9), %s358_s9, 32  }
  0x61   : > { %648 = vsyncadd (!%p500_p9), %s358_s9, 4294967264  ;;  %s367_s11 = scalar_lea.sflag [#allocation5], %s357_s6 }
  0x62   : > { %650 = dma.done.wait (!%p500_p9), %s367_s11, 32  }
  0x63   : > { %652 = vsyncadd (!%p500_p9), %s367_s11, 4294967264  ;;  %s21_s20 = sadd.s32 1, %s675_s20   ;;  %s873_s15 = smov %s659_s16 }
  0x64   : > { %p18_p10 = scmp.ge.s32.totalorder %s21_s20, 4   ;;  %s874_s16 = smov %s663_s17 }
  0x65   : > { %s875_s17 = smov %s757_s28  ;;  %s876_s18 = smov %s671_s19 }
  0x66   : > { %s877_s19 = smov %s879_s23  ;;  %20 = sbr.rel (!%p18_p10) target bundleno = 6 (0x6), region = 90 }
  0x6d   :  { %372 = vsyncpa [#allocation3], 1 }
  0x6e   :  { %374 = vsyncpa [#allocation3 + $0x1], 1 }
  0x6f   :  { %375 = vsyncpa [#allocation5], 1 }
  0x70   :  { %377 = vsyncpa [#allocation5 + $0x1], 1 }

</bundles_post_ra>
